<compile_context>
chip_gen: v7x
topology: tpu7x:2x2x1
jax: 0.10.0
libtpu: 0.0.40
codegen_flags: <defaults>
</compile_context>

<pallas_src>
import numpy as np
import jax
import jax.numpy as jnp
from jax import lax
from jax.experimental import pallas as pl
from jax.experimental.pallas import tpu as pltpu

KH = KW = 3  # 3x3 conv, padding=1, stride=1
EPS = 1e-5


def _bn_affine(gamma, beta, mean, var):
    """Fold eval-mode BN into per-channel affine y = x*s + b. Returns (C,), (C,)."""
    s = gamma / jnp.sqrt(var + EPS)
    b = beta - mean * s
    return s, b


def _pack_conv_w(w_oihw, out_scale=None):
    """(Cout, Cin, 3, 3) -> bf16 (Cout, 9*Cin); column index = k*Cin + ci, k = ky*3+kx.

    Optionally folds a per-output-channel scale (e.g. bn2's scale) into the weights.
    """
    cout, cin = w_oihw.shape[0], w_oihw.shape[1]
    w = jnp.transpose(w_oihw, (0, 2, 3, 1)).reshape(cout, KH * KW * cin)
    if out_scale is not None:
        w = w * out_scale.reshape(cout, 1)
    return w.astype(jnp.bfloat16)


def _edge_masks(H, W, L):
    """(8, L) f32 validity masks for the 8 non-center taps (center is all-ones)."""
    HW = H * W
    pix = np.arange(L) % HW
    hh, ww = pix // W, pix % W
    rows = []
    for k in range(KH * KW):
        if k == 4:  # center tap: always valid, no mask multiply needed
            continue
        dy, dx = k // KW - 1, k % KW - 1
        ok = (hh + dy >= 0) & (hh + dy < H) & (ww + dx >= 0) & (ww + dx < W)
        rows.append(ok.astype(np.float32))
    return jnp.asarray(np.stack(rows, axis=0))


def _make_kernel(C, W_img):
    def kernel(x_ref, bn_ref, w1_ref, w2_ref, m_ref, o_ref):
        L = x_ref.shape[1]
        x = x_ref[...].astype(jnp.float32)        # (C, L) lane-dense
        masks = m_ref[...]                        # (8, L) f32, VMEM-resident
        bn = bn_ref[...]                          # (C, 3) = [s1 | b1 | b2]
        s1, b1, b2 = bn[:, 0:1], bn[:, 1:2], bn[:, 2:3]

        def conv3x3(act, w_ref):
            """'Same' 3x3 conv as a single (Cout, 9Cin)x(9Cin, L) MXU contraction."""
            parts = []
            for k in range(KH * KW):
                dy, dx = k // KW - 1, k % KW - 1
                off = dy * W_img + dx
                shifted = act if off == 0 else pltpu.roll(
                    act, shift=(-off) % L, axis=1)          # XLU lane roll
                if k != 4:
                    mi = k if k < 4 else k - 1
                    shifted = shifted * masks[mi:mi + 1, :]  # zero wrapped/OOB taps
                parts.append(shifted)
            stacked = jnp.concatenate(parts, axis=0).astype(jnp.bfloat16)  # (9C, L)
            return jnp.dot(w_ref[...], stacked,
                           preferred_element_type=jnp.float32)             # (C, L) f32

        act = jnp.maximum(x * s1 + b1, 0.0)   # bn1 + relu (eval-mode affine)
        h = conv3x3(act, w1_ref)              # conv1 (bn2 scale pre-folded into w1)
        h = jnp.maximum(h + b2, 0.0)          # bn2 bias + relu
        out = conv3x3(h, w2_ref)              # conv2
        o_ref[...] = (out + x).astype(o_ref.dtype)   # residual add

    return kernel


def prepare_params(params):
    """Fold eval-mode BN into affines/weights once (reusable across many calls)."""
    s1, b1 = _bn_affine(params["bn1_gamma"], params["bn1_beta"],
                        params["bn1_mean"], params["bn1_var"])
    s2, b2 = _bn_affine(params["bn2_gamma"], params["bn2_beta"],
                        params["bn2_mean"], params["bn2_var"])
    bn_packed = jnp.stack([s1, b1, b2], axis=1).astype(jnp.float32)   # (C, 3)
    w1 = _pack_conv_w(params["conv1_w"], out_scale=s2)  # bn2 scale folded into conv1
    w2 = _pack_conv_w(params["conv2_w"])
    return bn_packed, w1, w2


def _pick_images_per_block(N, HW, target_lanes=4096):
    """Choose images-per-block: keep L large for DMA efficiency (v5e/v6e), but
    prefer >= 2 grid steps so the 'parallel' axis shards across both v7x TCs.
    For larger C/L, re-derive against v7x's 64 MiB VMEM (halve vs a v6e choice)."""
    divs = [d for d in range(1, N + 1) if N % d == 0]
    fit = [d for d in divs if d * HW <= target_lanes] or [1]
    multi = [d for d in fit if d < N and (d * HW) % 128 == 0]
    return max(multi) if multi else max(fit)


def preact_basic_block_cm(x_cm, prepared, H, W, images_per_block=None):
    """Channels-major forward.  x_cm: (C, N*H*W) float32 (lane-dense layout).

    Use this entry point when composing blocks into a network so activations
    stay channels-major and no NCHW relayout traffic is paid between blocks.
    """
    bn_packed, w1, w2 = prepared
    C, total = x_cm.shape
    HW = H * W
    N = total // HW
    assert total == N * HW
    nb = images_per_block if images_per_block is not None \
        else _pick_images_per_block(N, HW)
    assert N % nb == 0, "images_per_block must divide N"
    L = nb * HW
    if N // nb > 1:
        assert L % 128 == 0, "tile lane width must be a multiple of 128 when grid > 1"

    masks = _edge_masks(H, W, L)   # (8, L), ~tiny, stays VMEM-resident

    return pl.pallas_call(
        _make_kernel(C, W),
        out_shape=jax.ShapeDtypeStruct((C, total), x_cm.dtype),
        grid_spec=pltpu.PrefetchScalarGridSpec(
            num_scalar_prefetch=0,
            grid=(N // nb,),
            in_specs=[
                pl.BlockSpec((C, L), lambda g: (0, g)),             # x (lane-dense)
                pl.BlockSpec((C, 3), lambda g: (0, 0)),             # packed BN [s1|b1|b2]
                pl.BlockSpec((C, KH * KW * C), lambda g: (0, 0)),   # conv1 w (bf16, bn2-scaled)
                pl.BlockSpec((C, KH * KW * C), lambda g: (0, 0)),   # conv2 w (bf16)
                pl.BlockSpec((8, L), lambda g: (0, 0)),             # edge masks
            ],
            out_specs=pl.BlockSpec((C, L), lambda g: (0, g)),       # lane-dense store
        ),
        # Donate x's HBM buffer to the output: blocks are disjoint and x is fully
        # read into vregs before the single output store of each step.
        input_output_aliases={0: 0},
        compiler_params=pltpu.CompilerParams(
            dimension_semantics=("parallel",)),
    )(x_cm, bn_packed, w1, w2, masks)


def preact_basic_block(x_nchw, params, images_per_block=None):
    """NCHW-compatible wrapper (relayout once in / once out)."""
    N, C, H, W = x_nchw.shape
    x_cm = jnp.transpose(x_nchw, (1, 0, 2, 3)).reshape(C, N * H * W)
    out_cm = preact_basic_block_cm(x_cm, prepare_params(params), H, W,
                                   images_per_block)
    return jnp.transpose(out_cm.reshape(C, N, H, W), (1, 0, 2, 3))


def reference(x_nchw, params):
    """Pure-JAX (XLA, f32) reference matching PyTorch eval-mode forward."""
    def bn(x, g, b, m, v):
        g, b, m, v = (a[None, :, None, None] for a in (g, b, m, v))
        return (x - m) / jnp.sqrt(v + EPS) * g + b

    def conv(x, w):
        return lax.conv_general_dilated(
            x, w, window_strides=(1, 1), padding=((1, 1), (1, 1)),
            dimension_numbers=("NCHW", "OIHW", "NCHW"))

    out = jax.nn.relu(bn(x_nchw, params["bn1_gamma"], params["bn1_beta"],
                         params["bn1_mean"], params["bn1_var"]))
    out = conv(out, params["conv1_w"])
    out = jax.nn.relu(bn(out, params["bn2_gamma"], params["bn2_beta"],
                         params["bn2_mean"], params["bn2_var"]))
    out = conv(out, params["conv2_w"])
    return out + x_nchw


if __name__ == "__main__":
    key = jax.random.PRNGKey(0)
    N, C, H, W = 2, 4, 16, 16          # inplanes == planes == 4, stride=1
    ks = jax.random.split(key, 11)

    x = jax.random.normal(ks[0], (N, C, H, W), jnp.float32)
    params = {
        "bn1_gamma": 1.0 + 0.1 * jax.random.normal(ks[1], (C,), jnp.float32),
        "bn1_beta": 0.1 * jax.random.normal(ks[2], (C,), jnp.float32),
        "bn1_mean": 0.1 * jax.random.normal(ks[3], (C,), jnp.float32),
        "bn1_var": jnp.abs(jax.random.normal(ks[4], (C,), jnp.float32)) + 0.5,
        "conv1_w": 0.2 * jax.random.normal(ks[5], (C, C, 3, 3), jnp.float32),
        "bn2_gamma": 1.0 + 0.1 * jax.random.normal(ks[6], (C,), jnp.float32),
        "bn2_beta": 0.1 * jax.random.normal(ks[7], (C,), jnp.float32),
        "bn2_mean": 0.1 * jax.random.normal(ks[8], (C,), jnp.float32),
        "bn2_var": jnp.abs(jax.random.normal(ks[9], (C,), jnp.float32)) + 0.5,
        "conv2_w": 0.2 * jax.random.normal(ks[10], (C, C, 3, 3), jnp.float32),
    }

    fwd = jax.jit(preact_basic_block)
    out = fwd(x, params)
    jax.block_until_ready(out)

    ref = reference(x, params)
    assert out.shape == x.shape
    # Looser tolerance vs the pure-f32 XLA reference: MXU operands are bf16
    # (f32 accumulation), as recommended for native MXU rate on v5e/v6e/v7x.
    np.testing.assert_allclose(np.asarray(out), np.asarray(ref),
                               rtol=5e-2, atol=1e-1)
    print("KERNEL_OK")
</pallas_src>

<mosaic_0001>
module attributes {stable_mosaic.version = 11 : i64} {
  func.func @kernel(%arg0: i32, %arg1: memref<4x256xf32, #tpu.memory_space<vmem>>, %arg2: memref<4x3xf32, #tpu.memory_space<vmem>>, %arg3: memref<4x36xbf16, #tpu.memory_space<vmem>>, %arg4: memref<4x36xbf16, #tpu.memory_space<vmem>>, %arg5: memref<8x256xf32, #tpu.memory_space<vmem>>, %arg6: memref<4x256xf32, #tpu.memory_space<vmem>>) attributes {dimension_semantics = [#tpu.dimension_semantics<parallel>], iteration_bounds = array<i64: 2>, scalar_prefetch = 0 : i64, scratch_operands = 0 : i64, tpu.core_type = #tpu.core_type<tc>, window_params = [{transform_indices = @transform_0, window_bounds = array<i64: 4, 256>}, {pipeline_mode = #tpu.pipeline_mode<synchronous>, transform_indices = @transform_1, window_bounds = array<i64: 4, 3>}, {pipeline_mode = #tpu.pipeline_mode<synchronous>, transform_indices = @transform_2, window_bounds = array<i64: 4, 36>}, {pipeline_mode = #tpu.pipeline_mode<synchronous>, transform_indices = @transform_3, window_bounds = array<i64: 4, 36>}, {pipeline_mode = #tpu.pipeline_mode<synchronous>, transform_indices = @transform_4, window_bounds = array<i64: 8, 256>}, {transform_indices = @transform_5, window_bounds = array<i64: 4, 256>}]} {
    %c0 = arith.constant 0 : index
    %c0_0 = arith.constant 0 : index
    %0 = vector.load %arg1[%c0, %c0_0] : memref<4x256xf32, #tpu.memory_space<vmem>>, vector<4x256xf32>
    %c0_1 = arith.constant 0 : index
    %c0_2 = arith.constant 0 : index
    %1 = vector.load %arg5[%c0_1, %c0_2] : memref<8x256xf32, #tpu.memory_space<vmem>>, vector<8x256xf32>
    %c0_3 = arith.constant 0 : index
    %c0_4 = arith.constant 0 : index
    %2 = vector.load %arg2[%c0_3, %c0_4] : memref<4x3xf32, #tpu.memory_space<vmem>>, vector<4x3xf32>
    %3 = vector.extract_strided_slice %2 {offsets = [0, 0], sizes = [4, 1], strides = [1, 1]} : vector<4x3xf32> to vector<4x1xf32>
    %4 = vector.extract_strided_slice %2 {offsets = [0, 1], sizes = [4, 1], strides = [1, 1]} : vector<4x3xf32> to vector<4x1xf32>
    %5 = vector.extract_strided_slice %2 {offsets = [0, 2], sizes = [4, 1], strides = [1, 1]} : vector<4x3xf32> to vector<4x1xf32>
    %6 = vector.broadcast %3 : vector<4x1xf32> to vector<4x256xf32>
    %7 = arith.mulf %0, %6 : vector<4x256xf32>
    %8 = vector.broadcast %4 : vector<4x1xf32> to vector<4x256xf32>
    %9 = arith.addf %7, %8 : vector<4x256xf32>
    %cst = arith.constant 0.000000e+00 : f32
    %10 = vector.broadcast %cst : f32 to vector<4x256xf32>
    %11 = arith.maximumf %9, %10 : vector<4x256xf32>
    %c17_i32 = arith.constant 17 : i32
    %12 = tpu.dynamic_rotate %11 by %c17_i32 dim 1 : vector<4x256xf32>, i32 -> vector<4x256xf32>
    %13 = vector.extract_strided_slice %1 {offsets = [0, 0], sizes = [1, 256], strides = [1, 1]} : vector<8x256xf32> to vector<1x256xf32>
    %14 = vector.broadcast %13 : vector<1x256xf32> to vector<4x256xf32>
    %15 = arith.mulf %12, %14 : vector<4x256xf32>
    %c16_i32 = arith.constant 16 : i32
    %16 = tpu.dynamic_rotate %11 by %c16_i32 dim 1 : vector<4x256xf32>, i32 -> vector<4x256xf32>
    %17 = vector.extract_strided_slice %1 {offsets = [1, 0], sizes = [1, 256], strides = [1, 1]} : vector<8x256xf32> to vector<1x256xf32>
    %18 = vector.broadcast %17 : vector<1x256xf32> to vector<4x256xf32>
    %19 = arith.mulf %16, %18 : vector<4x256xf32>
    %c15_i32 = arith.constant 15 : i32
    %20 = tpu.dynamic_rotate %11 by %c15_i32 dim 1 : vector<4x256xf32>, i32 -> vector<4x256xf32>
    %21 = vector.extract_strided_slice %1 {offsets = [2, 0], sizes = [1, 256], strides = [1, 1]} : vector<8x256xf32> to vector<1x256xf32>
    %22 = vector.broadcast %21 : vector<1x256xf32> to vector<4x256xf32>
    %23 = arith.mulf %20, %22 : vector<4x256xf32>
    %c1_i32 = arith.constant 1 : i32
    %24 = tpu.dynamic_rotate %11 by %c1_i32 dim 1 : vector<4x256xf32>, i32 -> vector<4x256xf32>
    %25 = vector.extract_strided_slice %1 {offsets = [3, 0], sizes = [1, 256], strides = [1, 1]} : vector<8x256xf32> to vector<1x256xf32>
    %26 = vector.broadcast %25 : vector<1x256xf32> to vector<4x256xf32>
    %27 = arith.mulf %24, %26 : vector<4x256xf32>
    %c255_i32 = arith.constant 255 : i32
    %28 = tpu.dynamic_rotate %11 by %c255_i32 dim 1 : vector<4x256xf32>, i32 -> vector<4x256xf32>
    %29 = vector.extract_strided_slice %1 {offsets = [4, 0], sizes = [1, 256], strides = [1, 1]} : vector<8x256xf32> to vector<1x256xf32>
    %30 = vector.broadcast %29 : vector<1x256xf32> to vector<4x256xf32>
    %31 = arith.mulf %28, %30 : vector<4x256xf32>
    %c241_i32 = arith.constant 241 : i32
    %32 = tpu.dynamic_rotate %11 by %c241_i32 dim 1 : vector<4x256xf32>, i32 -> vector<4x256xf32>
    %33 = vector.extract_strided_slice %1 {offsets = [5, 0], sizes = [1, 256], strides = [1, 1]} : vector<8x256xf32> to vector<1x256xf32>
    %34 = vector.broadcast %33 : vector<1x256xf32> to vector<4x256xf32>
    %35 = arith.mulf %32, %34 : vector<4x256xf32>
    %c240_i32 = arith.constant 240 : i32
    %36 = tpu.dynamic_rotate %11 by %c240_i32 dim 1 : vector<4x256xf32>, i32 -> vector<4x256xf32>
    %37 = vector.extract_strided_slice %1 {offsets = [6, 0], sizes = [1, 256], strides = [1, 1]} : vector<8x256xf32> to vector<1x256xf32>
    %38 = vector.broadcast %37 : vector<1x256xf32> to vector<4x256xf32>
    %39 = arith.mulf %36, %38 : vector<4x256xf32>
    %c239_i32 = arith.constant 239 : i32
    %40 = tpu.dynamic_rotate %11 by %c239_i32 dim 1 : vector<4x256xf32>, i32 -> vector<4x256xf32>
    %41 = vector.extract_strided_slice %1 {offsets = [7, 0], sizes = [1, 256], strides = [1, 1]} : vector<8x256xf32> to vector<1x256xf32>
    %42 = vector.broadcast %41 : vector<1x256xf32> to vector<4x256xf32>
    %43 = arith.mulf %40, %42 : vector<4x256xf32>
    %44 = tpu.concatenate %15, %19, %23, %27, %11, %31, %35, %39, %43 in 0 : vector<4x256xf32>, vector<4x256xf32>, vector<4x256xf32>, vector<4x256xf32>, vector<4x256xf32>, vector<4x256xf32>, vector<4x256xf32>, vector<4x256xf32>, vector<4x256xf32> -> vector<36x256xf32>
    %45 = arith.truncf %44 : vector<36x256xf32> to vector<36x256xbf16>
    %c0_5 = arith.constant 0 : index
    %c0_6 = arith.constant 0 : index
    %46 = vector.load %arg3[%c0_5, %c0_6] : memref<4x36xbf16, #tpu.memory_space<vmem>>, vector<4x36xbf16>
    %cst_7 = arith.constant dense<0.000000e+00> : vector<4x256xf32>
    %47 = tpu.matmul %46, %45, %cst_7 {dimension_numbers = #tpu.dot_dimension_numbers<[1], [0], [0], [1], [0, 0, 1, 1], [], []>} : vector<4x36xbf16>, vector<36x256xbf16>, vector<4x256xf32> -> vector<4x256xf32>
    %48 = vector.broadcast %5 : vector<4x1xf32> to vector<4x256xf32>
    %49 = arith.addf %47, %48 : vector<4x256xf32>
    %cst_8 = arith.constant 0.000000e+00 : f32
    %50 = vector.broadcast %cst_8 : f32 to vector<4x256xf32>
    %51 = arith.maximumf %49, %50 : vector<4x256xf32>
    %c17_i32_9 = arith.constant 17 : i32
    %52 = tpu.dynamic_rotate %51 by %c17_i32_9 dim 1 : vector<4x256xf32>, i32 -> vector<4x256xf32>
    %53 = vector.extract_strided_slice %1 {offsets = [0, 0], sizes = [1, 256], strides = [1, 1]} : vector<8x256xf32> to vector<1x256xf32>
    %54 = vector.broadcast %53 : vector<1x256xf32> to vector<4x256xf32>
    %55 = arith.mulf %52, %54 : vector<4x256xf32>
    %c16_i32_10 = arith.constant 16 : i32
    %56 = tpu.dynamic_rotate %51 by %c16_i32_10 dim 1 : vector<4x256xf32>, i32 -> vector<4x256xf32>
    %57 = vector.extract_strided_slice %1 {offsets = [1, 0], sizes = [1, 256], strides = [1, 1]} : vector<8x256xf32> to vector<1x256xf32>
    %58 = vector.broadcast %57 : vector<1x256xf32> to vector<4x256xf32>
    %59 = arith.mulf %56, %58 : vector<4x256xf32>
    %c15_i32_11 = arith.constant 15 : i32
    %60 = tpu.dynamic_rotate %51 by %c15_i32_11 dim 1 : vector<4x256xf32>, i32 -> vector<4x256xf32>
    %61 = vector.extract_strided_slice %1 {offsets = [2, 0], sizes = [1, 256], strides = [1, 1]} : vector<8x256xf32> to vector<1x256xf32>
    %62 = vector.broadcast %61 : vector<1x256xf32> to vector<4x256xf32>
    %63 = arith.mulf %60, %62 : vector<4x256xf32>
    %c1_i32_12 = arith.constant 1 : i32
    %64 = tpu.dynamic_rotate %51 by %c1_i32_12 dim 1 : vector<4x256xf32>, i32 -> vector<4x256xf32>
    %65 = vector.extract_strided_slice %1 {offsets = [3, 0], sizes = [1, 256], strides = [1, 1]} : vector<8x256xf32> to vector<1x256xf32>
    %66 = vector.broadcast %65 : vector<1x256xf32> to vector<4x256xf32>
    %67 = arith.mulf %64, %66 : vector<4x256xf32>
    %c255_i32_13 = arith.constant 255 : i32
    %68 = tpu.dynamic_rotate %51 by %c255_i32_13 dim 1 : vector<4x256xf32>, i32 -> vector<4x256xf32>
    %69 = vector.extract_strided_slice %1 {offsets = [4, 0], sizes = [1, 256], strides = [1, 1]} : vector<8x256xf32> to vector<1x256xf32>
    %70 = vector.broadcast %69 : vector<1x256xf32> to vector<4x256xf32>
    %71 = arith.mulf %68, %70 : vector<4x256xf32>
    %c241_i32_14 = arith.constant 241 : i32
    %72 = tpu.dynamic_rotate %51 by %c241_i32_14 dim 1 : vector<4x256xf32>, i32 -> vector<4x256xf32>
    %73 = vector.extract_strided_slice %1 {offsets = [5, 0], sizes = [1, 256], strides = [1, 1]} : vector<8x256xf32> to vector<1x256xf32>
    %74 = vector.broadcast %73 : vector<1x256xf32> to vector<4x256xf32>
    %75 = arith.mulf %72, %74 : vector<4x256xf32>
    %c240_i32_15 = arith.constant 240 : i32
    %76 = tpu.dynamic_rotate %51 by %c240_i32_15 dim 1 : vector<4x256xf32>, i32 -> vector<4x256xf32>
    %77 = vector.extract_strided_slice %1 {offsets = [6, 0], sizes = [1, 256], strides = [1, 1]} : vector<8x256xf32> to vector<1x256xf32>
    %78 = vector.broadcast %77 : vector<1x256xf32> to vector<4x256xf32>
    %79 = arith.mulf %76, %78 : vector<4x256xf32>
    %c239_i32_16 = arith.constant 239 : i32
    %80 = tpu.dynamic_rotate %51 by %c239_i32_16 dim 1 : vector<4x256xf32>, i32 -> vector<4x256xf32>
    %81 = vector.extract_strided_slice %1 {offsets = [7, 0], sizes = [1, 256], strides = [1, 1]} : vector<8x256xf32> to vector<1x256xf32>
    %82 = vector.broadcast %81 : vector<1x256xf32> to vector<4x256xf32>
    %83 = arith.mulf %80, %82 : vector<4x256xf32>
    %84 = tpu.concatenate %55, %59, %63, %67, %51, %71, %75, %79, %83 in 0 : vector<4x256xf32>, vector<4x256xf32>, vector<4x256xf32>, vector<4x256xf32>, vector<4x256xf32>, vector<4x256xf32>, vector<4x256xf32>, vector<4x256xf32>, vector<4x256xf32> -> vector<36x256xf32>
    %85 = arith.truncf %84 : vector<36x256xf32> to vector<36x256xbf16>
    %c0_17 = arith.constant 0 : index
    %c0_18 = arith.constant 0 : index
    %86 = vector.load %arg4[%c0_17, %c0_18] : memref<4x36xbf16, #tpu.memory_space<vmem>>, vector<4x36xbf16>
    %cst_19 = arith.constant dense<0.000000e+00> : vector<4x256xf32>
    %87 = tpu.matmul %86, %85, %cst_19 {dimension_numbers = #tpu.dot_dimension_numbers<[1], [0], [0], [1], [0, 0, 1, 1], [], []>} : vector<4x36xbf16>, vector<36x256xbf16>, vector<4x256xf32> -> vector<4x256xf32>
    %88 = arith.addf %87, %0 : vector<4x256xf32>
    %c0_20 = arith.constant 0 : index
    %c0_21 = arith.constant 0 : index
    %89 = vector.load %arg6[%c0_20, %c0_21] : memref<4x256xf32, #tpu.memory_space<vmem>>, vector<4x256xf32>
    tpu.vector_store %arg6[%c0_20, %c0_21], %88 {strides = array<i32>} : memref<4x256xf32, #tpu.memory_space<vmem>>, vector<4x256xf32>,
    return
  }
  func.func @transform_0(%arg0: i32) -> (i32, i32) {
    %c0_i32 = arith.constant 0 : i32
    %c0_i32_0 = arith.constant 0 : i32
    return %c0_i32, %arg0 : i32, i32
  }
  func.func @transform_1(%arg0: i32) -> (i32, i32) {
    %c0_i32 = arith.constant 0 : i32
    %c0_i32_0 = arith.constant 0 : i32
    %c0_i32_1 = arith.constant 0 : i32
    return %c0_i32, %c0_i32_0 : i32, i32
  }
  func.func @transform_2(%arg0: i32) -> (i32, i32) {
    %c0_i32 = arith.constant 0 : i32
    %c0_i32_0 = arith.constant 0 : i32
    %c0_i32_1 = arith.constant 0 : i32
    return %c0_i32, %c0_i32_0 : i32, i32
  }
  func.func @transform_3(%arg0: i32) -> (i32, i32) {
    %c0_i32 = arith.constant 0 : i32
    %c0_i32_0 = arith.constant 0 : i32
    %c0_i32_1 = arith.constant 0 : i32
    return %c0_i32, %c0_i32_0 : i32, i32
  }
  func.func @transform_4(%arg0: i32) -> (i32, i32) {
    %c0_i32 = arith.constant 0 : i32
    %c0_i32_0 = arith.constant 0 : i32
    %c0_i32_1 = arith.constant 0 : i32
    return %c0_i32, %c0_i32_0 : i32, i32
  }
  func.func @transform_5(%arg0: i32) -> (i32, i32) {
    %c0_i32 = arith.constant 0 : i32
    %c0_i32_0 = arith.constant 0 : i32
    return %c0_i32, %arg0 : i32, i32
  }
}

</mosaic_0001>

<bundles_post_ra>
// kernel: preact_basic_block.1
= control target key start
LH: loop header
LB: loop body
LE: loop exit
PB: predicated region body
PF: predicated region fallthrough
CT: control target
= control target key end

     0   :  { %s805_s18 = smov 0   ;;  %s1119_s0 = inlined_call_operand.vmem [shape: f32[4,512], index: 0, kind: input, shape index: {}, may-alias: {0,5}]   ;;  %s1120_s1 = inlined_call_operand.vmem [shape: f32[4,3], index: 1, kind: input, shape index: {}]   ;;  %s1121_s2 = inlined_call_operand.vmem [shape: bf16[4,36], index: 2, kind: input, shape index: {}]   ;;  %s1122_s3 = inlined_call_operand.vmem [shape: bf16[4,36], index: 3, kind: input, shape index: {}]   ;;  %s1123_s4 = inlined_call_operand.vmem [shape: f32[8,256], index: 4, kind: input, shape index: {}]   ;;  %s1124_s5 = inlined_call_operand.vmem [shape: f32[4,512], index: 5, kind: output, shape index: {}, may-alias: {0,5}]  }
   0x1 LB: > { %s715_s19 = sadd.s32 4294967295, %s761_s18   ;;  %p719_p0 = scmp.ge.s32.totalorder %s761_s18, 1  ;;  %s761_s18 = sphi %s805_s18, %s15_s18  }
   0x2   : > { %p188_p1 = scmp.lt.s32.totalorder %s761_s18, 3 }
   0x4   : > { %p189_p2 = pnand %p719_p0, %p188_p1 }
   0x5   : > { %v232_v0 = vld [vmem:[%s1120_s1] sm:$0xf] (!%p189_p2)  ;;  %v763_v1 = vmov (!%p189_p2), 0   ;;  %v764_v2 = vmov (!%p189_p2), 1   ;;  %s720_s22 = sshll.u32 (!%p189_p2), %s715_s19, 1  ;;  %v240_v5 = vlaneseq (!%p189_p2)  ;;  %s766_s27 = smov (!%p189_p2), 16  }
   0x6   : > { %192 = sbr.rel (%p189_p2) target bundleno = 891 (0x37b), region = 40  ;;  %750 = vset.pattern.permute.xlu0 (!%p189_p2), %v763_v1  ;;  %487 = vmatprep.mubr.bf16.mxu0 (!%p189_p2), %v763_v1  ;;  %p217_p3 = scmp.lt.s32.totalorder (!%p189_p2), %s720_s22, 3  ;;  %v765_v3 = vmov (!%p189_p2), 839922192   ;;  %v774_v18 = vmov (!%p189_p2), 2   ;;  %v874_v26 = vld [vmem:[%s1123_s4] sm:$0xff] (!%p189_p2) }
   0x7   : > { %235 = vperm.xlu0 (!%p189_p2), %750, %v232_v0   ;;  %645 = vmatprep.mubr.bf16.mxu1 (!%p189_p2), %v763_v1  ;;  %v238_v4 = vunpack.c.l.s4 (!%p189_p2), %v765_v3  ;;  %v818_v7 = vshrl.u32 (!%p189_p2), %v240_v5, 7  ;;  %s767_s28 = smov (!%p189_p2), 1   ;;  %s768_s29 = smov (!%p189_p2), 17   ;;  %v868_v23 = vand.u32 (!%p189_p2), 127, %v240_v5  ;;  %v880_v28 = vld [vmem:[%s1123_s4 + $0x8] sm:$0xff] (!%p189_p2)  ;;  %vm424_vm4 = vcmask (!%p189_p2), 1043456  }
   0x8   : > { %s769_s30 = smov (!%p189_p2), 15   ;;  %s770_s6 = smov (!%p189_p2), 127   ;;  %752 = vset.pattern.permute.xlu1 (!%p189_p2), %v774_v18  ;;  %vm448_vm9 = vcmask (!%p189_p2), 1041408   ;;  %vm444_vm10 = vcmask (!%p189_p2), 293888  }
   0x9   : > { %v239_v6 = vunpack.c.0.s8 (!%p189_p2), %v238_v4  ;;  %s771_s7 = smov (!%p189_p2), 112   ;;  %s772_s8 = smov (!%p189_p2), 113   ;;  %v324_v24 = vsub.s32 (!%p189_p2), 3, %v818_v7  ;;  %v273_v27 = vsub.s32 (!%p189_p2), 0, %v818_v7  ;;  %v307_v30 = vsub.s32 (!%p189_p2), 2, %v818_v7 }
   0xa   : > { %s773_s9 = smov (!%p189_p2), 111   ;;  %vm319_vm0 = vcmp.lt.s32.totalorder (!%p189_p2), %v868_v23, 1  ;;  %v341_v33 = vsub.s32 (!%p189_p2), 4, %v818_v7  ;;  %vm268_vm1 = vcmp.lt.s32.totalorder (!%p189_p2), %v868_v23, 17  ;;  %v290_v36 = vsub.s32 (!%p189_p2), 1, %v818_v7 }
   0xb   : > { %751 = vset.pattern.permute.xlu0 (!%p189_p2), %v764_v2  ;;  %v242_v8 = vsub.s32 (!%p189_p2), %v239_v6, %v818_v7  ;;  %v885_v31 = vrot.slane (!%p189_p2), %v874_v26, %v324_v24  ;;  %v889_v34 = vrot.slane (!%p189_p2), %v880_v28, %v324_v24  ;;  %v893_v35 = vrot.slane (!%p189_p2), %v874_v26, %v273_v27 }
   0xc   : > { %247 = vperm.xlu0 (!%p189_p2), %751, %v232_v0   ;;  %v897_v37 = vrot.slane (!%p189_p2), %v880_v28, %v273_v27  ;;  %vm302_vm2 = vcmp.lt.s32.totalorder (!%p189_p2), %v868_v23, 15  ;;  %v901_v38 = vrot.slane (!%p189_p2), %v874_v26, %v307_v30  ;;  %v375_v40 = vsub.s32 (!%p189_p2), 6, %v818_v7 }
   0xd   : > { %s1126_s22 = smov (!%p217_p3, %s720_s22), 3  ;;  %v905_v41 = vrot.slane %v880_v28, %v307_v30  ;;  %vm336_vm3 = vcmp.lt.s32.totalorder %v868_v23, 127  ;;  %v358_v42 = vsub.s32 5, %v818_v7  ;;  %v914_v45 = vrot.slane %v874_v26, %v341_v33 }
   0xe   : > { %s721_s23 = sshll.u32 %s1126_s22, 2  ;;  %v917_v46 = vrot.slane %v880_v28, %v341_v33  ;;  %vm285_vm5 = vcmp.lt.s32.totalorder %v868_v23, 16  ;;  %v925_v50 = vrot.slane %v874_v26, %v290_v36  ;;  %v928_v51 = vrot.slane %v880_v28, %v290_v36 }
   0xf   : > { %s220_s26 = scalar_lea.vmem %s1119_s0, %s721_s23  ;;  %vm370_vm6 = vcmp.lt.s32.totalorder %v868_v23, 112  ;;  %v932_v52 = vrot.slane %v874_v26, %v375_v40  ;;  %v935_v53 = vrot.slane %v880_v28, %v375_v40  ;;  %vm353_vm7 = vcmp.lt.s32.totalorder %v868_v23, 113  ;;  %s226_s21 = scalar_lea.vmem %s1124_s5, %s721_s23 }
  0x10   : > { %v827_v11 = vld [vmem:[%s220_s26] sm:$0xff]  ;;  %753 = vset.pattern.permute.xlu0 %v774_v18  ;;  %v941_v56 = vrot.slane %v874_v26, %v358_v42  ;;  %v960_v5 = vrot.slane %v880_v28, %v358_v42  ;;  %v392_v6 = vsub.s32 7, %v818_v7  ;;  %vm387_vm8 = vcmp.lt.s32.totalorder %v868_v23, 111 }
  0x11   : > { %v600_v23 = vld [vmem:[%s1122_s3] sm:$0x3] }
  0x86   : > { %v236_v9 = vpop.permute.xlu0 %235 }
  0x87   : > { %v243_v10 = vrot.slane %v236_v9, %v242_v8 }
  0x89   : > { %v245_v13 = vmul.f32 %v243_v10, %v827_v11 }
  0x8b   : > { %v248_v12 = vpop.permute.xlu0 %247 }
  0x8c   : > { %v255_v14 = vrot.slane %v248_v12, %v242_v8 }
  0x8e   : > { %v257_v15 = vadd.f32 %v255_v14, %v245_v13 }
  0x90   : > { %v830_v16 = vmax.f32 %v257_v15, 0.0 }
  0x92   : > { %281 = vrot.lane.b32.xlu1 %v830_v16, %s766_s27  ;;  %v836_v17 = vcombine.high %v830_v16, %v830_v16 }
  0x94   : > { %317 = vrot.lane.b32.xlu0 %v836_v17, %s767_s28 }
  0x96   : > { %315 = vrot.lane.b32.xlu1 %v830_v16, %s767_s28 }
  0x98   : > { %264 = vrot.lane.b32.xlu0 %v836_v17, %s768_s29 }
  0x9a   : > { %262 = vrot.lane.b32.xlu1 %v830_v16, %s768_s29 }
  0x9c   : > { %300 = vrot.lane.b32.xlu0 %v836_v17, %s769_s30 }
  0x9e   : > { %298 = vrot.lane.b32.xlu1 %v830_v16, %s769_s30 }
  0xa0   : > { %334 = vrot.lane.b32.xlu0 %v836_v17, %s770_s6 }
  0xa2   : > { %332 = vrot.lane.b32.xlu1 %v830_v16, %s770_s6 }
  0xa4   : > { %368 = vrot.lane.b32.xlu0 %v836_v17, %s771_s7 }
  0xa6   : > { %283 = vrot.lane.b32.xlu1 %v836_v17, %s766_s27 }
  0xa8   : > { %351 = vrot.lane.b32.xlu0 %v836_v17, %s772_s8 }
  0xaa   : > { %366 = vrot.lane.b32.xlu1 %v830_v16, %s771_s7 }
  0xac   : > { %385 = vrot.lane.b32.xlu0 %v836_v17, %s773_s9 }
  0xae   : > { %349 = vrot.lane.b32.xlu1 %v830_v16, %s772_s8 }
  0xb2   : > { %383 = vrot.lane.b32.xlu1 %v830_v16, %s773_s9 }
  0xb6   : > { %441 = vperm.xlu1 %752, %v232_v0  }
 0x104   : > { %v282_v19 = vpop.permute.xlu1 %281 }
 0x106   : > { %v318_v20 = vpop.permute.xlu0 %317 }
 0x108   : > { %v316_v21 = vpop.permute.xlu1 %315 }
 0x109   : > { %v320_v43 = vsel %vm319_vm0, %v316_v21, %v318_v20  ;;  %v321_v44 = vsel %vm319_vm0, %v318_v20, %v316_v21 }
 0x10a   : > { %v265_v22 = vpop.permute.xlu0 %264  ;;  %v330_v54 = vmul.f32 %v885_v31, %v321_v44  ;;  %v331_v55 = vmul.f32 %v889_v34, %v320_v43  ;;  %v983_v44 = vrot.slane %v874_v26, %v392_v6 }
 0x10c   : > { %v263_v25 = vpop.permute.xlu1 %262  ;;  %v408_v8 = vrot.slane %v330_v54, 4  ;;  %v409_v9 = vrot.slane %v331_v55, 4 }
 0x10d   : > { %v269_v57 = vsel %vm268_vm1, %v263_v25, %v265_v22  ;;  %v270_v58 = vsel %vm268_vm1, %v265_v22, %v263_v25 }
 0x10e   : > { %v301_v29 = vpop.permute.xlu0 %300  ;;  %v279_v10 = vmul.f32 %v893_v35, %v270_v58  ;;  %v280_v12 = vmul.f32 %v897_v37, %v269_v57 }
 0x110   : > { %v299_v32 = vpop.permute.xlu1 %298 }
 0x111   : > { %v303_v48 = vsel %vm302_vm2, %v299_v32, %v301_v29  ;;  %v304_v49 = vsel %vm302_vm2, %v301_v29, %v299_v32 }
 0x112   : > { %v335_v39 = vpop.permute.xlu0 %334  ;;  %v313_v59 = vmul.f32 %v901_v38, %v304_v49  ;;  %v314_v60 = vmul.f32 %v905_v41, %v303_v48 }
 0x114   : > { %v333_v47 = vpop.permute.xlu1 %332  ;;  %v428_v7 = vsel %vm424_vm4, %v314_v60, %v409_v9  ;;  %v427_v22 = vsel %vm424_vm4, %v313_v59, %v408_v8 }
 0x115   : > { %v337_v63 = vsel %vm336_vm3, %v333_v47, %v335_v39  ;;  %v338_v0 = vsel %vm336_vm3, %v335_v39, %v333_v47  ;;  %v986_v47 = vrot.slane %v880_v28, %v392_v6 }
 0x116   : > { %v369_v61 = vpop.permute.xlu0 %368  ;;  %v347_v13 = vmul.f32 %v914_v45, %v337_v63  ;;  %v348_v14 = vmul.f32 %v917_v46, %v338_v0 }
 0x118   : > { %v284_v62 = vpop.permute.xlu1 %283  ;;  %v414_v36 = vrot.slane %v347_v13, 4  ;;  %v415_v39 = vrot.slane %v348_v14, 4 }
 0x119   : > { %v286_v1 = vsel %vm285_vm5, %v282_v19, %v284_v62  ;;  %v287_v2 = vsel %vm285_vm5, %v284_v62, %v282_v19 }
 0x11a   : > { %v296_v3 = vmul.f32 %v925_v50, %v287_v2  ;;  %v297_v4 = vmul.f32 %v928_v51, %v286_v1  ;;  %v352_v24 = vpop.permute.xlu0 %351  ;;  %v430_v59 = vsel %vm424_vm4, %v836_v17, %v415_v39  ;;  %v429_v26 = vsel %vm424_vm4, %v830_v16, %v414_v36 }
 0x11c   : > { %v402_v15 = vrot.slane %v296_v3, 4  ;;  %v403_v18 = vrot.slane %v297_v4, 4  ;;  %v367_v19 = vpop.permute.xlu1 %366  ;;  %v439_v4 = vld [vmem:[%s1121_s2] sm:$0x3] }
 0x11d   : > { %v371_v20 = vsel %vm370_vm6, %v367_v19, %v369_v61  ;;  %v372_v21 = vsel %vm370_vm6, %v369_v61, %v367_v19 }
 0x11e   : > { %v381_v25 = vmul.f32 %v932_v52, %v371_v20  ;;  %v382_v27 = vmul.f32 %v935_v53, %v372_v21  ;;  %v426_v29 = vsel %vm424_vm4, %v280_v12, %v403_v18  ;;  %v425_v30 = vsel %vm424_vm4, %v279_v10, %v402_v15  ;;  %v386_v57 = vpop.permute.xlu0 %385 }
 0x11f   : > { %v434_v32 = vpack.c.bf16 %v428_v7, %v426_v29  ;;  %v433_v33 = vpack.c.bf16 %v427_v22, %v425_v30 }
 0x120   : > { %v350_v40 = vpop.permute.xlu1 %349  ;;  %v420_v48 = vrot.slane %v381_v25, 4  ;;  %v421_v49 = vrot.slane %v382_v27, 4 }
 0x121   : > { %v354_v42 = vsel %vm353_vm7, %v350_v40, %v352_v24  ;;  %v355_v43 = vsel %vm353_vm7, %v352_v24, %v350_v40  ;;  %455 = vmatprep.subr.bf16.mxu0 %v434_v32 }
 0x122   : > { %v364_v54 = vmul.f32 %v941_v56, %v354_v42  ;;  %v365_v55 = vmul.f32 %v960_v5, %v355_v43  ;;  %456 = vmatpush1.bf16.msra.mxu0 %v433_v33 }
 0x124   : > { %v384_v58 = vpop.permute.xlu1 %383  ;;  %v432_v60 = vsel %vm424_vm4, %v365_v55, %v421_v49  ;;  %v431_v28 = vsel %vm424_vm4, %v364_v54, %v420_v48 }
 0x125   : > { %v388_v61 = vsel %vm387_vm8, %v384_v58, %v386_v57  ;;  %v389_v62 = vsel %vm387_vm8, %v386_v57, %v384_v58  ;;  %v436_v63 = vpack.c.bf16 %v432_v60, %v430_v59  ;;  %v435_v0 = vpack.c.bf16 %v431_v28, %v429_v26 }
 0x126   : > { %v398_v1 = vmul.f32 %v983_v44, %v388_v61  ;;  %v399_v2 = vmul.f32 %v986_v47, %v389_v62 }
 0x127   : > { %457 = vmatprep.subr.bf16.mxu0 %v436_v63 }
 0x128   : > { %v437_v17 = vpack.c.bf16 %v398_v1, %v398_v1  ;;  %v438_v3 = vpack.c.bf16 %v399_v2, %v399_v2  ;;  %458 = vmatpush1.bf16.msra.mxu0 %v435_v0 }
 0x12a   : > { %724 = vmatprep.subr.msk.bf16.mxu0 %vm448_vm9, %v438_v3  ;;  %v450_v16 = vsel %vm448_vm9, %v437_v17, 0 }
 0x12c   : > { %460 = vmatpush1.bf16.msra.mxu0 %v450_v16 }
 0x12f   : > { %725 = vmatmul.mubr.msk.bf16.vlgmr.msra.gmra.mrb[0].mxu0 %vm444_vm10, %v439_v4 }
 0x135   : > { %v442_v6 = vpop.permute.xlu1 %441 }
 0x202   : > { %v489_v8 = vpop.f32.mrb[0].mxu0 }
 0x203   : > { %v490_v9 = vadd.f32 %v489_v8, %v442_v6  ;;  %v491_v10 = vpop.f32.mrb[1].mxu0 }
 0x204   : > { %v492_v12 = vadd.f32 %v491_v10, %v442_v6  ;;  %v493_v13 = vpop.f32.mrb[2].mxu0 }
 0x205   : > { %v1008_v14 = vmax.f32 %v490_v9, 0.0  ;;  %v494_v15 = vpop.f32.mrb[3].mxu0 }
 0x206   : > { %v1010_v18 = vmax.f32 %v492_v12, 0.0 }
 0x207   : > { %506 = vrot.lane.b32.xlu0 %v1008_v14, %s766_s27 }
 0x208   : > { %508 = vrot.lane.b32.xlu1 %v1010_v18, %s766_s27 }
 0x20b   : > { %522 = vrot.lane.b32.xlu0 %v1008_v14, %s767_s28 }
 0x20c   : > { %524 = vrot.lane.b32.xlu1 %v1010_v18, %s767_s28 }
 0x20f   : > { %498 = vrot.lane.b32.xlu0 %v1008_v14, %s768_s29 }
 0x210   : > { %500 = vrot.lane.b32.xlu1 %v1010_v18, %s768_s29 }
 0x213   : > { %514 = vrot.lane.b32.xlu0 %v1008_v14, %s769_s30 }
 0x214   : > { %516 = vrot.lane.b32.xlu1 %v1010_v18, %s769_s30 }
 0x217   : > { %530 = vrot.lane.b32.xlu0 %v1008_v14, %s770_s6 }
 0x218   : > { %532 = vrot.lane.b32.xlu1 %v1010_v18, %s770_s6 }
 0x21b   : > { %546 = vrot.lane.b32.xlu0 %v1008_v14, %s771_s7 }
 0x21c   : > { %548 = vrot.lane.b32.xlu1 %v1010_v18, %s771_s7 }
 0x21f   : > { %538 = vrot.lane.b32.xlu0 %v1008_v14, %s772_s8 }
 0x220   : > { %540 = vrot.lane.b32.xlu1 %v1010_v18, %s772_s8 }
 0x223   : > { %554 = vrot.lane.b32.xlu0 %v1008_v14, %s773_s9 }
 0x224   : > { %556 = vrot.lane.b32.xlu1 %v1010_v18, %s773_s9 }
 0x279   : > { %v507_v19 = vpop.permute.xlu0 %506 }
 0x27a   : > { %v509_v20 = vpop.permute.xlu1 %508 }
 0x27b   : > { %v510_v22 = vsel %vm285_vm5, %v507_v19, %v509_v20  ;;  %v511_v24 = vsel %vm285_vm5, %v509_v20, %v507_v19 }
 0x27c   : > { %v512_v32 = vmul.f32 %v511_v24, %v925_v50  ;;  %v513_v33 = vmul.f32 %v510_v22, %v928_v51 }
 0x27d   : > { %v523_v21 = vpop.permute.xlu0 %522 }
 0x27e   : > { %v525_v7 = vpop.permute.xlu1 %524  ;;  %v564_v55 = vrot.slane %v512_v32, 4  ;;  %v565_v50 = vrot.slane %v513_v33, 4 }
 0x27f   : > { %v526_v25 = vsel %vm319_vm0, %v523_v21, %v525_v7  ;;  %v527_v27 = vsel %vm319_vm0, %v525_v7, %v523_v21 }
 0x280   : > { %v528_v40 = vmul.f32 %v527_v27, %v885_v31  ;;  %v529_v42 = vmul.f32 %v526_v25, %v889_v34 }
 0x281   : > { %v499_v29 = vpop.permute.xlu0 %498 }
 0x282   : > { %v501_v30 = vpop.permute.xlu1 %500  ;;  %v570_v58 = vrot.slane %v528_v40, 4  ;;  %v571_v59 = vrot.slane %v529_v42, 4 }
 0x283   : > { %v502_v36 = vsel %vm268_vm1, %v499_v29, %v501_v30  ;;  %v503_v39 = vsel %vm268_vm1, %v501_v30, %v499_v29 }
 0x284   : > { %v504_v48 = vmul.f32 %v503_v39, %v893_v35  ;;  %v505_v49 = vmul.f32 %v502_v36, %v897_v37 }
 0x285   : > { %v515_v43 = vpop.permute.xlu0 %514 }
 0x286   : > { %v517_v54 = vpop.permute.xlu1 %516  ;;  %v587_v35 = vsel %vm424_vm4, %v505_v49, %v565_v50  ;;  %v586_v28 = vsel %vm424_vm4, %v504_v48, %v564_v55 }
 0x287   : > { %v518_v51 = vsel %vm302_vm2, %v515_v43, %v517_v54  ;;  %v519_v57 = vsel %vm302_vm2, %v517_v54, %v515_v43 }
 0x288   : > { %v520_v31 = vmul.f32 %v519_v57, %v901_v38  ;;  %v521_v34 = vmul.f32 %v518_v51, %v905_v41 }
 0x289   : > { %v531_v60 = vpop.permute.xlu0 %530 }
 0x28a   : > { %v533_v26 = vpop.permute.xlu1 %532  ;;  %v589_v37 = vsel %vm424_vm4, %v521_v34, %v571_v59  ;;  %v588_v61 = vsel %vm424_vm4, %v520_v31, %v570_v58 }
 0x28b   : > { %v534_v62 = vsel %vm336_vm3, %v531_v60, %v533_v26  ;;  %v535_v63 = vsel %vm336_vm3, %v533_v26, %v531_v60  ;;  %v595_v0 = vpack.c.bf16 %v589_v37, %v587_v35  ;;  %v594_v38 = vpack.c.bf16 %v588_v61, %v586_v28 }
 0x28c   : > { %v536_v1 = vmul.f32 %v534_v62, %v914_v45  ;;  %v537_v2 = vmul.f32 %v535_v63, %v917_v46 }
 0x28d   : > { %613 = vmatprep.subr.bf16.mxu1 %v595_v0  ;;  %v547_v41 = vpop.permute.xlu0 %546 }
 0x28e   : > { %v549_v17 = vpop.permute.xlu1 %548  ;;  %614 = vmatpush1.bf16.msra.mxu1 %v594_v38  ;;  %v576_v9 = vrot.slane %v536_v1, 4  ;;  %v577_v10 = vrot.slane %v537_v2, 4 }
 0x28f   : > { %v550_v3 = vsel %vm370_vm6, %v547_v41, %v549_v17  ;;  %v551_v16 = vsel %vm370_vm6, %v549_v17, %v547_v41 }
 0x290   : > { %v552_v4 = vmul.f32 %v550_v3, %v932_v52  ;;  %v553_v6 = vmul.f32 %v551_v16, %v935_v53  ;;  %v591_v53 = vsel %vm424_vm4, %v1010_v18, %v577_v10  ;;  %v590_v22 = vsel %vm424_vm4, %v1008_v14, %v576_v9 }
 0x291   : > { %v539_v8 = vpop.permute.xlu0 %538 }
 0x292   : > { %v541_v12 = vpop.permute.xlu1 %540  ;;  %v582_v13 = vrot.slane %v552_v4, 4  ;;  %v583_v15 = vrot.slane %v553_v6, 4 }
 0x293   : > { %v542_v45 = vsel %vm353_vm7, %v539_v8, %v541_v12  ;;  %v543_v46 = vsel %vm353_vm7, %v541_v12, %v539_v8 }
 0x294   : > { %v544_v19 = vmul.f32 %v542_v45, %v941_v56  ;;  %v545_v20 = vmul.f32 %v543_v46, %v960_v5 }
 0x295   : > { %v555_v21 = vpop.permute.xlu0 %554 }
 0x296   : > { %v557_v52 = vpop.permute.xlu1 %556  ;;  %v593_v7 = vsel %vm424_vm4, %v545_v20, %v583_v15  ;;  %v592_v24 = vsel %vm424_vm4, %v544_v19, %v582_v13 }
 0x297   : > { %v558_v25 = vsel %vm387_vm8, %v555_v21, %v557_v52  ;;  %v559_v56 = vsel %vm387_vm8, %v557_v52, %v555_v21  ;;  %v597_v27 = vpack.c.bf16 %v593_v7, %v591_v53  ;;  %v596_v5 = vpack.c.bf16 %v592_v24, %v590_v22 }
 0x298   : > { %v560_v29 = vmul.f32 %v558_v25, %v983_v44  ;;  %v561_v30 = vmul.f32 %v559_v56, %v986_v47  ;;  %v602_v44 = vcombine.high %v827_v11, %v827_v11 }
 0x299   : > { %615 = vmatprep.subr.bf16.mxu1 %v597_v27 }
 0x29a   : > { %v598_v18 = vpack.c.bf16 %v560_v29, %v560_v29  ;;  %v599_v32 = vpack.c.bf16 %v561_v30, %v561_v30  ;;  %616 = vmatpush1.bf16.msra.mxu1 %v596_v5 }
 0x29c   : > { %726 = vmatprep.subr.msk.bf16.mxu1 %vm448_vm9, %v599_v32  ;;  %v608_v14 = vsel %vm448_vm9, %v598_v18, 0 }
 0x29e   : > { %618 = vmatpush1.bf16.msra.mxu1 %v608_v14 }
 0x2a1   : > { %727 = vmatmul.mubr.msk.bf16.vlgmr.msra.gmra.mrb[0].mxu1 %vm444_vm10, %v600_v23 }
 0x374   : > { %v647_v47 = vpop.f32.mrb[0].mxu1 }
 0x375   : > { %v648_v33 = vadd.f32 %v647_v47, %v827_v11  ;;  %v649_v36 = vpop.f32.mrb[1].mxu1 }
 0x376   : > { %v650_v39 = vadd.f32 %v649_v36, %v602_v44  ;;  %v651_v40 = vpop.f32.mrb[2].mxu1 }
 0x377   : > { %v652_v42 = vpop.f32.mrb[3].mxu1 }
 0x378   : > { %v656_v43 = vcombine.low %v648_v33, %v650_v39 }
 0x37a   : > { %658 = vst [vmem:[%s226_s21] sm:$0xff] %v656_v43 }
 0x37b PF: > { %s15_s18 = sadd.s32 1, %s761_s18  }
 0x37c   : > { %p12_p4 = scmp.ge.s32.totalorder %s15_s18, 4  }
 0x37e   :  { %14 = sbr.rel (!%p12_p4) target bundleno = 1 (0x1), region = 70 }

</bundles_post_ra>
